<compile_context>
chip_gen: v5e
topology: v5e:2x2
jax: 0.10.0
libtpu: 0.0.40
codegen_flags: <defaults>
</compile_context>

<pallas_src>
import functools

import numpy as np

import jax
import jax.numpy as jnp
from jax.experimental import pallas as pl
from jax.experimental.pallas import tpu as pltpu


def _round_up(n, m):
    return ((n + m - 1) // m) * m


# ----------------------------------------------------------------------------
# Fused kernel: folded conv -> aligned sliding max -> linear2 -> relu
#               -> linear3 -> tanh -> L1 normalization
# ----------------------------------------------------------------------------
def _actor_fused_kernel(x_ref, w12_ref, b12_ref, wl2_ref, bl2_ref,
                        wl3_ref, bl3_ref, out_ref, *, K, chunk):
    # x_ref  : (bb, A*L*F)        bf16 states, per-row order (action, time, feature)
    # w12_ref: (A*L*F, K*chunk)   bf16 folded conv1∘conv2, columns permuted to
    #                             (k, a, j, c) with zero padding per chunk
    # b12_ref: (1, K*chunk)       f32 folded bias (same permutation/padding)
    # wl2_ref: (chunk, H)  bf16   linear2 weight with pool-window selection,
    #                             PyTorch flatten permutation and zero-padded
    #                             rows folded in;        bl2_ref: (1, H) f32
    # wl3_ref: (H, A)      bf16   linear3 weight;        bl3_ref: (1, A) f32
    # out_ref: (bb, A)     f32
    x = x_ref[...]

    # Single folded-affine conv matmul, f32 accumulation on the MXU.
    h2 = jnp.dot(x, w12_ref[...],
                 preferred_element_type=jnp.float32) + b12_ref[...]   # (bb, K*chunk)

    # MaxPool1d(K): the K taps of every pooled window live in K lane-aligned,
    # 128-multiple-wide chunks, so the pool is K-1 aligned maxima on the VPU.
    win = h2[:, 0:chunk]
    for k in range(1, K):
        win = jnp.maximum(win, h2[:, k * chunk:(k + 1) * chunk])       # (bb, chunk)

    # linear2 + ReLU (flatten permutation + padded-row zeros are inside wl2).
    h = jnp.dot(win.astype(jnp.bfloat16), wl2_ref[...],
                preferred_element_type=jnp.float32) + bl2_ref[...]
    h = jnp.maximum(h, 0.0)

    # linear3 + tanh
    y = jnp.tanh(jnp.dot(h.astype(jnp.bfloat16), wl3_ref[...],
                         preferred_element_type=jnp.float32) + bl3_ref[...])

    # L1 normalization over actions; EUP reciprocal + one Newton refinement.
    denom = jnp.maximum(jnp.sum(jnp.abs(y), axis=-1, keepdims=True), 1e-12)
    r = pl.reciprocal(denom, approx=True)
    r = r * (2.0 - denom * r)
    out_ref[...] = (y * r).astype(out_ref.dtype)


# ----------------------------------------------------------------------------
# One-time parameter re-layout (NOT in the per-call forward path)
# ----------------------------------------------------------------------------
def prepare_params(params, *, num_actions, seq_len, n_features,
                   conv_channel_size, kernel_size):
    A, L, F, C, K = num_actions, seq_len, n_features, conv_channel_size, kernel_size
    L1 = L - K + 1
    L2 = L1 - K + 1
    Lp = L2 // K
    H = params["lin2_w"].shape[0]

    def toeplitz(w, l_in):
        # w: (C_out, C_in, K) PyTorch Conv1d weight -> T of shape
        # (l_in*C_in, l_out*C_out) s.t.  y[l*C_out+co] = sum_r x[r] * T[r, l*C_out+co]
        # reproduces a valid, stride-1 cross-correlation on channels-last rows.
        w = np.asarray(w, np.float32)
        c_out, c_in, k = w.shape
        l_out = l_in - k + 1
        t = np.zeros((l_in * c_in, l_out * c_out), np.float32)
        for kk in range(k):
            for l in range(l_out):
                t[(l + kk) * c_in:(l + kk + 1) * c_in,
                  l * c_out:(l + 1) * c_out] = w[:, :, kk].T
        return t

    def block_diag(t, n):
        r, c = t.shape
        out = np.zeros((n * r, n * c), np.float32)
        for a in range(n):
            out[a * r:(a + 1) * r, a * c:(a + 1) * c] = t
        return out

    # Block-diagonal (over actions) Toeplitz conv weights, then fold the two
    # affine convs into a single matmul (no nonlinearity between them).
    w1_big = block_diag(toeplitz(params["conv1_w"], L), A)            # (A*L*F,  A*L1*C)
    b1_big = np.tile(np.asarray(params["conv1_b"], np.float32), A * L1)[None, :]
    w2_big = block_diag(toeplitz(params["conv2_w"], L1), A)           # (A*L1*C, A*L2*C)
    b2_big = np.tile(np.asarray(params["conv2_b"], np.float32), A * L2)[None, :]

    w12 = w1_big @ w2_big                                             # (A*L*F, A*L2*C)
    b12 = b1_big @ w2_big + b2_big                                    # (1, A*L2*C)

    # Permute + zero-pad columns so MaxPool1d(K) becomes K lane-aligned chunk
    # maxima.  New column order: (pool tap k, action a, pooled pos j, chan c);
    # each tap chunk is padded from A*Lp*C up to a multiple of 128 lanes.
    chunk_real = A * Lp * C
    chunk = _round_up(chunk_real, 128)
    w12_p = np.zeros((A * L * F, K * chunk), np.float32)
    b12_p = np.zeros((1, K * chunk), np.float32)
    for k in range(K):
        for a in range(A):
            for j in range(Lp):
                old = a * L2 * C + (j * K + k) * C
                new = k * chunk + (a * Lp + j) * C
                w12_p[:, new:new + C] = w12[:, old:old + C]
                b12_p[0, new:new + C] = b12[0, old:old + C]

    # PyTorch flattens the pooled (B*A, C, Lp) tensor as (a, c, j) per batch
    # row; the kernel's pooled chunk is ordered (a, j, c).  Fold the column
    # permutation and the padded zero rows into linear2's weight.
    wl2 = np.asarray(params["lin2_w"], np.float32)                    # (H, A*C*Lp)
    wl2_sel = np.zeros((chunk, H), np.float32)
    for a in range(A):
        for j in range(Lp):
            for c in range(C):
                wl2_sel[(a * Lp + j) * C + c, :] = wl2[:, a * C * Lp + c * Lp + j]
    bl2 = np.asarray(params["lin2_b"], np.float32)[None, :]

    wl3 = np.asarray(params["lin3_w"], np.float32).T                  # (H, A)
    bl3 = np.asarray(params["lin3_b"], np.float32)[None, :]

    # Weights in bf16 (MXU-rate), biases in f32 (added after f32 accumulation).
    jb = lambda x: jnp.asarray(x, jnp.bfloat16)
    jf = lambda x: jnp.asarray(x, jnp.float32)
    return {
        "w12": jb(w12_p), "b12": jf(b12_p),
        "wl2": jb(wl2_sel), "bl2": jf(bl2),
        "wl3": jb(wl3), "bl3": jf(bl3),
        "dims": dict(A=A, L=L, F=F, C=C, K=K, L1=L1, L2=L2, Lp=Lp, H=H,
                     chunk=chunk),
    }


# ----------------------------------------------------------------------------
# Forward wrapper: a single pallas_call, gridded over the batch axis
# ----------------------------------------------------------------------------
def actor_forward(state, prepped, *, batch_block=1024):
    if state.ndim == 1:                       # PyTorch's 1-D state path
        return actor_forward(state[None, :], prepped, batch_block=batch_block)[0]
    B, d_in = state.shape
    dims = prepped["dims"]
    A, K, chunk = dims["A"], dims["K"], dims["chunk"]
    assert d_in == dims["A"] * dims["L"] * dims["F"], d_in

    if B <= 16:
        bb = B                                # single full-batch block
    else:
        # >=2 grid steps so both v7x TensorCores get work; multiples of 16 keep
        # bf16 (16,128) sublane packing happy on partial batches.
        bb = min(_round_up(batch_block, 16), _round_up(pl.cdiv(B, 2), 16))
    grid = (pl.cdiv(B, bb),)

    w12, b12 = prepped["w12"], prepped["b12"]
    wl2, bl2 = prepped["wl2"], prepped["bl2"]
    wl3, bl3 = prepped["wl3"], prepped["bl3"]

    def _resident(a):                         # full array, fetched once, stays in VMEM
        return pl.BlockSpec(a.shape, lambda i: (0, 0))

    return pl.pallas_call(
        functools.partial(_actor_fused_kernel, K=K, chunk=chunk),
        grid=grid,
        out_shape=jax.ShapeDtypeStruct((B, A), jnp.float32),
        in_specs=[pl.BlockSpec((bb, d_in), lambda i: (i, 0)),
                  _resident(w12), _resident(b12),
                  _resident(wl2), _resident(bl2),
                  _resident(wl3), _resident(bl3)],
        out_specs=pl.BlockSpec((bb, A), lambda i: (i, 0)),
        compiler_params=pltpu.CompilerParams(dimension_semantics=("parallel",)),
    )(state.astype(jnp.bfloat16), w12, b12, wl2, bl2, wl3, bl3)


# ----------------------------------------------------------------------------
# Pure-JAX reference (PyTorch semantics, f32; correctness check only)
# ----------------------------------------------------------------------------
def actor_forward_ref(state, params, *, num_actions, seq_len, n_features,
                      conv_channel_size, kernel_size, hidden_size):
    B = state.shape[0]
    A, L, F, C, K = num_actions, seq_len, n_features, conv_channel_size, kernel_size
    L1 = L - K + 1
    L2 = L1 - K + 1
    Lp = L2 // K
    N = B * A
    x = state.reshape(N, L, F).transpose(0, 2, 1)                     # NCL like PyTorch

    w1, b1 = params["conv1_w"], params["conv1_b"]
    h1 = b1[None, :, None] + sum(
        jnp.einsum("nfl,cf->ncl", x[:, :, k:k + L1], w1[:, :, k]) for k in range(K))
    w2, b2 = params["conv2_w"], params["conv2_b"]
    h2 = b2[None, :, None] + sum(
        jnp.einsum("ncl,dc->ndl", h1[:, :, k:k + L2], w2[:, :, k]) for k in range(K))
    pooled = h2[:, :, :Lp * K].reshape(N, C, Lp, K).max(axis=-1)      # (N, C, Lp)
    flat = pooled.reshape(B, -1)
    h = jax.nn.relu(flat @ params["lin2_w"].T + params["lin2_b"])
    y = jnp.tanh(h @ params["lin3_w"].T + params["lin3_b"])
    return y / jnp.sum(jnp.abs(y), axis=-1, keepdims=True)


def init_params(key, *, n_features, num_actions, conv_channel_size, kernel_size,
                conv_output_size, hidden_size, init_w):
    F, C, K = n_features, conv_channel_size, kernel_size
    A, H = num_actions, hidden_size
    D = A * C * conv_output_size
    ks = jax.random.split(key, 8)

    def u(k, shape, bound):
        return jax.random.uniform(k, shape, jnp.float32, -bound, bound)

    b_c1 = 1.0 / (F * K) ** 0.5
    b_c2 = 1.0 / (C * K) ** 0.5
    b_l2 = 1.0 / D ** 0.5
    return {
        "conv1_w": u(ks[0], (C, F, K), b_c1),
        "conv1_b": u(ks[1], (C,), b_c1),
        "conv2_w": u(ks[2], (C, C, K), b_c2),
        "conv2_b": u(ks[3], (C,), b_c2),
        "lin2_w": u(ks[4], (H, D), b_l2),
        "lin2_b": u(ks[5], (H,), b_l2),
        "lin3_w": u(ks[6], (A, H), init_w),
        "lin3_b": u(ks[7], (A,), init_w),
    }


if __name__ == "__main__":
    # Small config consistent with the module's constructor.
    B = 2
    n_features = 4
    seq_len = 16
    num_actions = 3
    hidden_size = 32
    conv_channel_size = 8
    kernel_size = 3
    n_layer = 2
    init_w = 3e-3

    conv_output_size = seq_len
    for _ in range(n_layer):
        conv_output_size = conv_output_size - kernel_size + 1
    conv_output_size = int(conv_output_size / kernel_size)            # = 4

    key = jax.random.PRNGKey(0)
    pkey, skey = jax.random.split(key)
    params = init_params(
        pkey, n_features=n_features, num_actions=num_actions,
        conv_channel_size=conv_channel_size, kernel_size=kernel_size,
        conv_output_size=conv_output_size, hidden_size=hidden_size, init_w=init_w)

    # state: (batch, num_actions * seq_len * n_features)
    state = jax.random.normal(
        skey, (B, num_actions * seq_len * n_features), jnp.float32)

    # One-time parameter layout prep (kept out of the per-call hot path).
    prepped = prepare_params(
        params, num_actions=num_actions, seq_len=seq_len, n_features=n_features,
        conv_channel_size=conv_channel_size, kernel_size=kernel_size)

    fwd = jax.jit(lambda s: actor_forward(s, prepped))
    out = jax.block_until_ready(fwd(state))

    ref = actor_forward_ref(
        state, params, num_actions=num_actions, seq_len=seq_len,
        n_features=n_features, conv_channel_size=conv_channel_size,
        kernel_size=kernel_size, hidden_size=hidden_size)

    assert out.shape == (B, num_actions), out.shape
    # Tolerance reflects bf16 matmul inputs (f32 accumulation) vs the f32
    # reference; outputs are L1-normalized so magnitudes are O(1/A).
    assert bool(jnp.allclose(out, ref, rtol=3e-2, atol=3e-2)), (out, ref)

    print("KERNEL_OK")
</pallas_src>

<mosaic_0001>
module attributes {stable_mosaic.version = 11 : i64} {
  func.func @_actor_fused_kernel(%arg0: i32, %arg1: memref<2x192xbf16, #tpu.memory_space<vmem>>, %arg2: memref<192x384xbf16, #tpu.memory_space<vmem>>, %arg3: memref<1x384xf32, #tpu.memory_space<vmem>>, %arg4: memref<128x32xbf16, #tpu.memory_space<vmem>>, %arg5: memref<1x32xf32, #tpu.memory_space<vmem>>, %arg6: memref<32x3xbf16, #tpu.memory_space<vmem>>, %arg7: memref<1x3xf32, #tpu.memory_space<vmem>>, %arg8: memref<2x3xf32, #tpu.memory_space<vmem>>) attributes {dimension_semantics = [#tpu.dimension_semantics<parallel>], iteration_bounds = array<i64: 1>, scalar_prefetch = 0 : i64, scratch_operands = 0 : i64, tpu.core_type = #tpu.core_type<tc>, window_params = [{transform_indices = @transform_0, window_bounds = array<i64: 2, 192>}, {pipeline_mode = #tpu.pipeline_mode<synchronous>, transform_indices = @transform_1, window_bounds = array<i64: 192, 384>}, {pipeline_mode = #tpu.pipeline_mode<synchronous>, transform_indices = @transform_2, window_bounds = array<i64: 1, 384>}, {pipeline_mode = #tpu.pipeline_mode<synchronous>, transform_indices = @transform_3, window_bounds = array<i64: 128, 32>}, {pipeline_mode = #tpu.pipeline_mode<synchronous>, transform_indices = @transform_4, window_bounds = array<i64: 1, 32>}, {pipeline_mode = #tpu.pipeline_mode<synchronous>, transform_indices = @transform_5, window_bounds = array<i64: 32, 3>}, {pipeline_mode = #tpu.pipeline_mode<synchronous>, transform_indices = @transform_6, window_bounds = array<i64: 1, 3>}, {transform_indices = @transform_7, window_bounds = array<i64: 2, 3>}]} {
    %c0 = arith.constant 0 : index
    %c0_0 = arith.constant 0 : index
    %0 = vector.load %arg1[%c0, %c0_0] : memref<2x192xbf16, #tpu.memory_space<vmem>>, vector<2x192xbf16>
    %c0_1 = arith.constant 0 : index
    %c0_2 = arith.constant 0 : index
    %1 = vector.load %arg2[%c0_1, %c0_2] : memref<192x384xbf16, #tpu.memory_space<vmem>>, vector<192x384xbf16>
    %cst = arith.constant dense<0.000000e+00> : vector<2x384xf32>
    %2 = tpu.matmul %0, %1, %cst {dimension_numbers = #tpu.dot_dimension_numbers<[1], [0], [0], [1], [0, 0, 1, 1], [], []>} : vector<2x192xbf16>, vector<192x384xbf16>, vector<2x384xf32> -> vector<2x384xf32>
    %c0_3 = arith.constant 0 : index
    %c0_4 = arith.constant 0 : index
    %3 = vector.load %arg3[%c0_3, %c0_4] : memref<1x384xf32, #tpu.memory_space<vmem>>, vector<1x384xf32>
    %4 = vector.broadcast %3 : vector<1x384xf32> to vector<2x384xf32>
    %5 = arith.addf %2, %4 : vector<2x384xf32>
    %6 = vector.extract_strided_slice %5 {offsets = [0, 0], sizes = [2, 128], strides = [1, 1]} : vector<2x384xf32> to vector<2x128xf32>
    %7 = vector.extract_strided_slice %5 {offsets = [0, 128], sizes = [2, 128], strides = [1, 1]} : vector<2x384xf32> to vector<2x128xf32>
    %8 = arith.maximumf %6, %7 : vector<2x128xf32>
    %9 = vector.extract_strided_slice %5 {offsets = [0, 256], sizes = [2, 128], strides = [1, 1]} : vector<2x384xf32> to vector<2x128xf32>
    %10 = arith.maximumf %8, %9 : vector<2x128xf32>
    %11 = arith.truncf %10 : vector<2x128xf32> to vector<2x128xbf16>
    %c0_5 = arith.constant 0 : index
    %c0_6 = arith.constant 0 : index
    %12 = vector.load %arg4[%c0_5, %c0_6] : memref<128x32xbf16, #tpu.memory_space<vmem>>, vector<128x32xbf16>
    %cst_7 = arith.constant dense<0.000000e+00> : vector<2x32xf32>
    %13 = tpu.matmul %11, %12, %cst_7 {dimension_numbers = #tpu.dot_dimension_numbers<[1], [0], [0], [1], [0, 0, 1, 1], [], []>} : vector<2x128xbf16>, vector<128x32xbf16>, vector<2x32xf32> -> vector<2x32xf32>
    %c0_8 = arith.constant 0 : index
    %c0_9 = arith.constant 0 : index
    %14 = vector.load %arg5[%c0_8, %c0_9] : memref<1x32xf32, #tpu.memory_space<vmem>>, vector<1x32xf32>
    %15 = vector.broadcast %14 : vector<1x32xf32> to vector<2x32xf32>
    %16 = arith.addf %13, %15 : vector<2x32xf32>
    %cst_10 = arith.constant 0.000000e+00 : f32
    %17 = vector.broadcast %cst_10 : f32 to vector<2x32xf32>
    %18 = arith.maximumf %16, %17 : vector<2x32xf32>
    %19 = arith.truncf %18 : vector<2x32xf32> to vector<2x32xbf16>
    %c0_11 = arith.constant 0 : index
    %c0_12 = arith.constant 0 : index
    %20 = vector.load %arg6[%c0_11, %c0_12] : memref<32x3xbf16, #tpu.memory_space<vmem>>, vector<32x3xbf16>
    %cst_13 = arith.constant dense<0.000000e+00> : vector<2x3xf32>
    %21 = tpu.matmul %19, %20, %cst_13 {dimension_numbers = #tpu.dot_dimension_numbers<[1], [0], [0], [1], [0, 0, 1, 1], [], []>} : vector<2x32xbf16>, vector<32x3xbf16>, vector<2x3xf32> -> vector<2x3xf32>
    %c0_14 = arith.constant 0 : index
    %c0_15 = arith.constant 0 : index
    %22 = vector.load %arg7[%c0_14, %c0_15] : memref<1x3xf32, #tpu.memory_space<vmem>>, vector<1x3xf32>
    %23 = vector.broadcast %22 : vector<1x3xf32> to vector<2x3xf32>
    %24 = arith.addf %21, %23 : vector<2x3xf32>
    %25 = math.tanh %24 : vector<2x3xf32>
    %26 = math.absf %25 : vector<2x3xf32>
    %cst_16 = arith.constant dense<0.000000e+00> : vector<2xf32>
    %27 = vector.multi_reduction <add>, %26, %cst_16 [1] : vector<2x3xf32> to vector<2xf32>
    %28 = vector.shape_cast %27 : vector<2xf32> to vector<2x1xf32>
    %cst_17 = arith.constant 9.99999996E-13 : f32
    %29 = vector.broadcast %cst_17 : f32 to vector<2x1xf32>
    %30 = arith.maximumf %28, %29 : vector<2x1xf32>
    %31 = tpu.reciprocal %30 {approx = true} : vector<2x1xf32> -> vector<2x1xf32>
    %32 = arith.mulf %30, %31 : vector<2x1xf32>
    %cst_18 = arith.constant 2.000000e+00 : f32
    %33 = vector.broadcast %cst_18 : f32 to vector<2x1xf32>
    %34 = arith.subf %33, %32 : vector<2x1xf32>
    %35 = arith.mulf %31, %34 : vector<2x1xf32>
    %36 = vector.broadcast %35 : vector<2x1xf32> to vector<2x3xf32>
    %37 = arith.mulf %25, %36 : vector<2x3xf32>
    %c0_19 = arith.constant 0 : index
    %c0_20 = arith.constant 0 : index
    %38 = vector.load %arg8[%c0_19, %c0_20] : memref<2x3xf32, #tpu.memory_space<vmem>>, vector<2x3xf32>
    tpu.vector_store %arg8[%c0_19, %c0_20], %37 {strides = array<i32>} : memref<2x3xf32, #tpu.memory_space<vmem>>, vector<2x3xf32>,
    return
  }
  func.func @transform_0(%arg0: i32) -> (i32, i32) {
    %c0_i32 = arith.constant 0 : i32
    %c0_i32_0 = arith.constant 0 : i32
    return %arg0, %c0_i32 : i32, i32
  }
  func.func @transform_1(%arg0: i32) -> (i32, i32) {
    %c0_i32 = arith.constant 0 : i32
    %c0_i32_0 = arith.constant 0 : i32
    %c0_i32_1 = arith.constant 0 : i32
    return %c0_i32, %c0_i32_0 : i32, i32
  }
  func.func @transform_2(%arg0: i32) -> (i32, i32) {
    %c0_i32 = arith.constant 0 : i32
    %c0_i32_0 = arith.constant 0 : i32
    %c0_i32_1 = arith.constant 0 : i32
    return %c0_i32, %c0_i32_0 : i32, i32
  }
  func.func @transform_3(%arg0: i32) -> (i32, i32) {
    %c0_i32 = arith.constant 0 : i32
    %c0_i32_0 = arith.constant 0 : i32
    %c0_i32_1 = arith.constant 0 : i32
    return %c0_i32, %c0_i32_0 : i32, i32
  }
  func.func @transform_4(%arg0: i32) -> (i32, i32) {
    %c0_i32 = arith.constant 0 : i32
    %c0_i32_0 = arith.constant 0 : i32
    %c0_i32_1 = arith.constant 0 : i32
    return %c0_i32, %c0_i32_0 : i32, i32
  }
  func.func @transform_5(%arg0: i32) -> (i32, i32) {
    %c0_i32 = arith.constant 0 : i32
    %c0_i32_0 = arith.constant 0 : i32
    %c0_i32_1 = arith.constant 0 : i32
    return %c0_i32, %c0_i32_0 : i32, i32
  }
  func.func @transform_6(%arg0: i32) -> (i32, i32) {
    %c0_i32 = arith.constant 0 : i32
    %c0_i32_0 = arith.constant 0 : i32
    %c0_i32_1 = arith.constant 0 : i32
    return %c0_i32, %c0_i32_0 : i32, i32
  }
  func.func @transform_7(%arg0: i32) -> (i32, i32) {
    %c0_i32 = arith.constant 0 : i32
    %c0_i32_0 = arith.constant 0 : i32
    return %arg0, %c0_i32 : i32, i32
  }
}

</mosaic_0001>

<bundles_post_ra>
// kernel: _lambda_.1
= control target key start
LH: loop header
LB: loop body
LE: loop exit
PB: predicated region body
PF: predicated region fallthrough
CT: control target
= control target key end

     0   :  { %12 = vsyncpa [#allocation3], 0  ;;  %s991_s0 = inlined_call_operand.vmem [shape: bf16[2,192], index: 0, kind: input, shape index: {}]   ;;  %s992_s1 = inlined_call_operand.hbm [shape: bf16[192,384], index: 1, kind: input, shape index: {}]   ;;  %s993_s2 = inlined_call_operand.vmem [shape: f32[1,384], index: 2, kind: input, shape index: {}]   ;;  %s994_s3 = inlined_call_operand.hbm [shape: bf16[128,32], index: 3, kind: input, shape index: {}]   ;;  %s995_s4 = inlined_call_operand.vmem [shape: f32[1,32], index: 4, kind: input, shape index: {}]   ;;  %s996_s5 = inlined_call_operand.hbm [shape: bf16[32,3], index: 5, kind: input, shape index: {}]   ;;  %s997_s6 = inlined_call_operand.vmem [shape: f32[1,3], index: 6, kind: input, shape index: {}]   ;;  %s998_s7 = inlined_call_operand.hbm [shape: f32[2,3], index: 7, kind: output, shape index: {}]  }
   0x1   :  { %13 = vsyncpa [#allocation6], 0  ;;  %s36_s26 = sshll.u32 %s994_s3, 4  ;;  %s37_s26 = int_to_ptr.hbm [resolvable:$true] %s36_s26 }
   0x2   :  { %14 = vsyncpa [#allocation4], 0  ;;  %s914_s27 = smov [#allocation5]   ;;  %s21_s8 = sshll.u32 %s992_s1, 4  ;;  %s22_s8 = int_to_ptr.hbm [resolvable:$true] %s21_s8 }
   0x3   :  { %s38_s28 = sshll.u32 %s914_s27, 4  ;;  %s915_s9 = smov 64   ;;  %s39_s28 = int_to_ptr.vmem [resolvable:$true] %s38_s28 }
   0x4   :  { %s916_s10 = smov 4   ;;  %s917_s11 = smov [#allocation2]  }
   0x5   :  { %44 = dma.hbm_to_vmem [thread:$0]  %s37_s26, 1024, %s39_s28, [#allocation6], %s915_s9, %s915_s9, %s916_s10  }
   0x6   :  { %s23_s12 = sshll.u32 %s917_s11, 4  ;;  %s918_s13 = smov 192   ;;  %s24_s12 = int_to_ptr.vmem [resolvable:$true] %s23_s12 }
   0x7   :  { %s919_s14 = smov 12   ;;  %s51_s16 = sshll.u32 %s996_s5, 4  ;;  %s52_s16 = int_to_ptr.hbm [resolvable:$true] %s51_s16 }
   0x8   :  { %29 = dma.hbm_to_vmem [thread:$0]  %s22_s8, 4608, %s24_s12, [#allocation3], %s918_s13, %s918_s13, %s919_s14  }
   0x9   :  { %s920_s17 = smov [#allocation7]  }
   0xa   :  { %s53_s18 = sshll.u32 %s920_s17, 4  ;;  %s54_s18 = int_to_ptr.vmem [resolvable:$true] %s53_s18 }
   0xb   :  { %59 = dma.hbm_to_vmem [thread:$0]  %s52_s16, 256, %s54_s18, [#allocation6], %s915_s9, %s915_s9, %s916_s10  }
   0xc   :  { %908 = dma.done.wait [#allocation3], 4608  }
   0xd   :  { %909 = vsyncadd [#allocation3], 4294962688 }
   0xe   :  { %910 = dma.done.wait [#allocation6], 1280  }
   0xf   :  { %911 = vsyncadd [#allocation6], 4294966016  ;;  %v650_v0 = vld [vmem:[#allocation2 + $0xa8] sm:$0xf]  ;;  %v774_v1 = vld [vmem:[#allocation2 + $0xb0] sm:$0xf0] }
  0x10   :  { %v698_v2 = vld [vmem:[#allocation2 + $0x108] sm:$0xf]  ;;  %v651_v3 = vor.u32 %v774_v1, %v650_v0  ;;  %v786_v4 = vld [vmem:[#allocation2 + $0x110] sm:$0xf0]  ;;  %v773_v5 = vld [vmem:[#allocation2 + $0xac] sm:$0xf] }
  0x11   :  { %v652_v6 = vld [vmem:[#allocation2 + $0xb4] sm:$0xf0]  ;;  %v699_v7 = vor.u32 %v786_v4, %v698_v2  ;;  %v785_v9 = vld [vmem:[#allocation2 + $0x10c] sm:$0xf]  ;;  %v638_v11 = vld [vmem:[#allocation2 + $0x90] sm:$0xf] }
  0x12   :  { %v655_v8 = vor.u32 %v773_v5, %v652_v6  ;;  %v700_v10 = vld [vmem:[#allocation2 + $0x114] sm:$0xf0]  ;;  %332 = vmatpush.bf16.msra.mxu0 %v651_v3  ;;  %v771_v13 = vld [vmem:[#allocation2 + $0x98] sm:$0xf0]  ;;  %v686_v14 = vld [vmem:[#allocation2 + $0xf0] sm:$0xf] }
  0x13   :  { %v703_v12 = vor.u32 %v785_v9, %v700_v10  ;;  %v783_v15 = vld [vmem:[#allocation2 + $0xf8] sm:$0xf0]  ;;  %349 = vmatpush.bf16.msra.mxu1 %v699_v7  ;;  %v639_v16 = vor.u32 %v771_v13, %v638_v11  ;;  %v770_v18 = vld [vmem:[#allocation2 + $0x94] sm:$0xf]  ;;  %v640_v19 = vld [vmem:[#allocation2 + $0x9c] sm:$0xf0] }
  0x14   :  { %358 = vmatpush.bf16.msra.mxu2 %v655_v8  ;;  %v687_v17 = vor.u32 %v783_v15, %v686_v14  ;;  %v782_v20 = vld [vmem:[#allocation2 + $0xf4] sm:$0xf]  ;;  %v643_v21 = vor.u32 %v770_v18, %v640_v19  ;;  %v688_v22 = vld [vmem:[#allocation2 + $0xfc] sm:$0xf0]  ;;  %v626_v23 = vld [vmem:[#allocation2 + $0x78] sm:$0xf] }
  0x15   :  { %375 = vmatpush.bf16.msra.mxu3 %v703_v12  ;;  %v768_v24 = vld [vmem:[#allocation2 + $0x80] sm:$0xf0]  ;;  %v691_v25 = vor.u32 %v782_v20, %v688_v22  ;;  %v674_v26 = vld [vmem:[#allocation2 + $0xd8] sm:$0xf]  ;;  %v767_v28 = vld [vmem:[#allocation2 + $0x7c] sm:$0xf] }
  0x16   :  { %v780_v27 = vld [vmem:[#allocation2 + $0xe0] sm:$0xf0]  ;;  %333 = vmatpush.bf16.msra.mxu0 %v639_v16  ;;  %v627_v29 = vor.u32 %v768_v24, %v626_v23  ;;  %v628_v30 = vld [vmem:[#allocation2 + $0x84] sm:$0xf0]  ;;  %v779_v31 = vld [vmem:[#allocation2 + $0xdc] sm:$0xf] }
  0x17   :  { %v676_v32 = vld [vmem:[#allocation2 + $0xe4] sm:$0xf0]  ;;  %350 = vmatpush.bf16.msra.mxu1 %v687_v17  ;;  %v675_v33 = vor.u32 %v780_v27, %v674_v26  ;;  %v631_v34 = vor.u32 %v767_v28, %v628_v30  ;;  %v614_v35 = vld [vmem:[#allocation2 + $0x60] sm:$0xf]  ;;  %v765_v36 = vld [vmem:[#allocation2 + $0x68] sm:$0xf0] }
  0x18   :  { %359 = vmatpush.bf16.msra.mxu2 %v643_v21  ;;  %v662_v37 = vld [vmem:[#allocation2 + $0xc0] sm:$0xf]  ;;  %v679_v38 = vor.u32 %v779_v31, %v676_v32  ;;  %v777_v39 = vld [vmem:[#allocation2 + $0xc8] sm:$0xf0]  ;;  %v764_v40 = vld [vmem:[#allocation2 + $0x64] sm:$0xf]  ;;  %v615_v45 = vor.u32 %v765_v36, %v614_v35 }
  0x19   :  { %376 = vmatpush.bf16.msra.mxu3 %v691_v25  ;;  %v616_v41 = vld [vmem:[#allocation2 + $0x6c] sm:$0xf0]  ;;  %v776_v42 = vld [vmem:[#allocation2 + $0xc4] sm:$0xf]  ;;  %v775_v46 = vld [vmem:[#allocation2 + $0xb8] sm:$0xf0]  ;;  %v663_v48 = vor.u32 %v777_v39, %v662_v37 }
  0x1a   :  { %v664_v43 = vld [vmem:[#allocation2 + $0xcc] sm:$0xf0]  ;;  %334 = vmatpush.bf16.msra.mxu0 %v627_v29  ;;  %v602_v47 = vld [vmem:[#allocation2 + $0x48] sm:$0xf]  ;;  %v619_v49 = vor.u32 %v764_v40, %v616_v41  ;;  %v762_v50 = vld [vmem:[#allocation2 + $0x50] sm:$0xf0] }
  0x1b   :  { %v658_v44 = vld [vmem:[#allocation2 + $0xb0] sm:$0xf]  ;;  %351 = vmatpush.bf16.msra.mxu1 %v675_v33  ;;  %v761_v51 = vld [vmem:[#allocation2 + $0x4c] sm:$0xf]  ;;  %v75_v52 = vld [vmem:[%s991_s0] sm:$0x3]  ;;  %v667_v53 = vor.u32 %v776_v42, %v664_v43  ;;  %v603_v60 = vor.u32 %v762_v50, %v602_v47 }
  0x1c   :  { %360 = vmatpush.bf16.msra.mxu2 %v631_v34  ;;  %v659_v54 = vor.u32 %v775_v46, %v658_v44  ;;  %v604_v55 = vld [vmem:[#allocation2 + $0x54] sm:$0xf0]  ;;  %133 = vst [vmem:[#allocation1] ss:$9 sm:$0xff] %v75_v52  ;;  %v772_v57 = vld [vmem:[#allocation2 + $0xa0] sm:$0xf0] }
  0x1d   :  { %377 = vmatpush.bf16.msra.mxu3 %v679_v38  ;;  %v646_v56 = vld [vmem:[#allocation2 + $0x98] sm:$0xf]  ;;  %v706_v58 = vld [vmem:[#allocation2 + $0x110] sm:$0xf]  ;;  %v787_v59 = vld [vmem:[#allocation2 + $0x118] sm:$0xf0]  ;;  %v607_v62 = vor.u32 %v761_v51, %v604_v55 }
  0x1e   :  { %335 = vmatpush.bf16.msra.mxu0 %v615_v45  ;;  %v707_v61 = vor.u32 %v787_v59, %v706_v58  ;;  %v590_v63 = vld [vmem:[#allocation2 + $0x30] sm:$0xf]  ;;  %v759_v0 = vld [vmem:[#allocation2 + $0x38] sm:$0xf0]  ;;  %v694_v1 = vld [vmem:[#allocation2 + $0xf8] sm:$0xf]  ;;  %v647_v2 = vor.u32 %v772_v57, %v646_v56 }
  0x1f   :  { %352 = vmatpush.bf16.msra.mxu1 %v663_v48  ;;  %v758_v3 = vld [vmem:[#allocation2 + $0x34] sm:$0xf]  ;;  %v592_v4 = vld [vmem:[#allocation2 + $0x3c] sm:$0xf0]  ;;  %v784_v5 = vld [vmem:[#allocation2 + $0x100] sm:$0xf0]  ;;  %v591_v9 = vor.u32 %v759_v0, %v590_v63 }
  0x20   :  { %361 = vmatpush.bf16.msra.mxu2 %v619_v49  ;;  %vm329_vm0 = vcmask 523264   ;;  %v634_v6 = vld [vmem:[#allocation2 + $0x80] sm:$0xf]  ;;  %v769_v7 = vld [vmem:[#allocation2 + $0x88] sm:$0xf0]  ;;  %v695_v8 = vor.u32 %v784_v5, %v694_v1  ;;  %v595_v13 = vor.u32 %v758_v3, %v592_v4  ;;  %v795_v47 = vld [vmem:[#allocation5 + $0x38] sm:$0xff] }
  0x21   :  { %378 = vmatpush.bf16.msra.mxu3 %v667_v53  ;;  %v682_v10 = vld [vmem:[#allocation2 + $0xe0] sm:$0xf]  ;;  %v781_v11 = vld [vmem:[#allocation2 + $0xe8] sm:$0xf0]  ;;  %v578_v14 = vld [vmem:[#allocation2 + $0x18] sm:$0xf]  ;;  %v635_v16 = vor.u32 %v769_v7, %v634_v6 }
  0x22   :  { %336 = vmatpush.bf16.msra.mxu0 %v603_v60  ;;  %v756_v15 = vld [vmem:[#allocation2 + $0x20] sm:$0xf0]  ;;  %v755_v17 = vld [vmem:[#allocation2 + $0x1c] sm:$0xf]  ;;  %v580_v18 = vld [vmem:[#allocation2 + $0x24] sm:$0xf0]  ;;  %v683_v21 = vor.u32 %v781_v11, %v682_v10 }
  0x23   :  { %384 = vmatpush.bf16.msrb.mxu1 %v659_v54  ;;  %v135_v12 = vld [vmem:[#allocation1 + $0x9] sm:$0xff]  ;;  %v766_v20 = vld [vmem:[#allocation2 + $0x70] sm:$0xf0]  ;;  %v579_v22 = vor.u32 %v756_v15, %v578_v14  ;;  %v583_v25 = vor.u32 %v755_v17, %v580_v18  ;;  %v753_v27 = vld [vmem:[#allocation2 + $0x8] sm:$0xf0]  ;;  %vm516_vm1 = vcmask 261120  }
  0x24   :  { %362 = vmatpush.bf16.msra.mxu2 %v607_v62  ;;  %709 = vmatmul.msk.bf16.vlgmr.msra.gmra.mxu3 %vm329_vm0, %v135_v12  ;;  %v622_v19 = vld [vmem:[#allocation2 + $0x68] sm:$0xf]  ;;  %v778_v24 = vld [vmem:[#allocation2 + $0xd0] sm:$0xf0]  ;;  %v566_v26 = vld [vmem:[#allocation2] sm:$0xf] }
  0x25   :  { %401 = vmatpush.bf16.msrb.mxu3 %v707_v61  ;;  %708 = vmatmul.msk.bf16.vlgmr.msra.gmra.mxu1 %vm329_vm0, %v135_v12  ;;  %v670_v23 = vld [vmem:[#allocation2 + $0xc8] sm:$0xf]  ;;  %v752_v28 = vld [vmem:[#allocation2 + $0x4] sm:$0xf]  ;;  %v623_v29 = vor.u32 %v766_v20, %v622_v19  ;;  %v568_v30 = vld [vmem:[#allocation2 + $0xc] sm:$0xf0]  ;;  %v567_v34 = vor.u32 %v753_v27, %v566_v26 }
  0x26   :  { %337 = vmatpush.bf16.msra.mxu0 %v591_v9  ;;  %v610_v31 = vld [vmem:[#allocation2 + $0x50] sm:$0xf]  ;;  %v763_v32 = vld [vmem:[#allocation2 + $0x58] sm:$0xf0]  ;;  %v671_v33 = vor.u32 %v778_v24, %v670_v23  ;;  %v571_v35 = vor.u32 %v752_v28, %v568_v30  ;;  %v598_v37 = vld [vmem:[#allocation2 + $0x38] sm:$0xf] }
  0x27   :  { %385 = vmatpush.bf16.msrb.mxu1 %v647_v2  ;;  %v611_v36 = vor.u32 %v763_v32, %v610_v31  ;;  %v760_v38 = vld [vmem:[#allocation2 + $0x40] sm:$0xf0]  ;;  %v134_v39 = vld [vmem:[#allocation1] sm:$0xff]  ;;  %v586_v41 = vld [vmem:[#allocation2 + $0x20] sm:$0xf]  ;;  %vm535_vm2 = vcmask 17408  }
  0x28   :  { %363 = vmatpush.bf16.msra.mxu2 %v595_v13  ;;  %v599_v40 = vor.u32 %v760_v38, %v598_v37  ;;  %v757_v42 = vld [vmem:[#allocation2 + $0x28] sm:$0xf0]  ;;  %v574_v44 = vld [vmem:[#allocation2 + $0x8] sm:$0xf]  ;;  %v754_v45 = vld [vmem:[#allocation2 + $0x10] sm:$0xf0] }
  0x29   :  { %402 = vmatpush.bf16.msrb.mxu3 %v695_v8  ;;  %v587_v43 = vor.u32 %v757_v42, %v586_v41  ;;  %v575_v46 = vor.u32 %v754_v45, %v574_v44  ;;  %v794_v48 = vld [vmem:[#allocation5 + $0x30] sm:$0xff]  ;;  %v793_v49 = vld [vmem:[#allocation5 + $0x28] sm:$0xff]  ;;  %v792_v50 = vld [vmem:[#allocation5 + $0x20] sm:$0xff]  ;;  %s553_s25 = sshll.u32 %s998_s7, 4  ;;  %s554_s25 = int_to_ptr.hbm [resolvable:$true] %s553_s25 }
  0x2a   :  { %338 = vmatpush.bf16.msra.mxu0 %v579_v22  ;;  %v791_v51 = vld [vmem:[#allocation5 + $0x18] sm:$0xff]  ;;  %v790_v52 = vld [vmem:[#allocation5 + $0x10] sm:$0xff]  ;;  %v789_v53 = vld [vmem:[#allocation5 + $0x8] sm:$0xff] }
  0x2b   :  { %386 = vmatpush.bf16.msrb.mxu1 %v635_v16  ;;  %v788_v54 = vld [vmem:[#allocation5] sm:$0xff]  ;;  %v797_v56 = vld [vmem:[#allocation7 + $0x8] sm:$0xff]  ;;  %v124_v62 = vld [vmem:[%s993_s2] sm:$0x7] }
  0x2c   :  { %364 = vmatpush.bf16.msra.mxu2 %v583_v25  ;;  %v796_v58 = vld [vmem:[#allocation7] sm:$0xff]  ;;  %v127_v63 = vperm.slane %v124_v62, 1  ;;  %v126_v0 = vperm.slane %v124_v62, 0  ;;  %v128_v6 = vperm.slane %v124_v62, 2  ;;  %v806_v18 = vld [vmem:[%s995_s4] ss:$0 sm:$0xff] }
  0x2d   :  { %403 = vmatpush.bf16.msrb.mxu3 %v683_v21  ;;  %v807_v24 = vld [vmem:[%s997_s6] ss:$0 sm:$0xff]  ;;  %s921_s4 = smov [#allocation8]  }
  0x2e   :  { %339 = vmatpush.bf16.msra.mxu0 %v567_v34  ;;  %s551_s23 = sshll.u32 %s921_s4, 4  ;;  %s552_s23 = int_to_ptr.vmem [resolvable:$true] %s551_s23 }
  0x2f   :  { %387 = vmatpush.bf16.msrb.mxu1 %v623_v29 }
  0x30   :  { %365 = vmatpush.bf16.msra.mxu2 %v571_v35 }
  0x31   :  { %404 = vmatpush.bf16.msrb.mxu3 %v671_v33  ;;  %340 = vmatmul.bf16.vlgmr.msra.gmra.mxu0 %v134_v39 }
  0x32   :  { %481 = vmatpush.bf16.msrb.mxu0 %v795_v47 }
  0x33   :  { %388 = vmatpush.bf16.msrb.mxu1 %v611_v36  ;;  %366 = vmatmul.bf16.vlgmr.msra.gmra.mxu2 %v134_v39 }
  0x34   :  { %710 = vmatmul.msk.bf16.vlgmr.msrb.gmra.mxu3 %vm329_vm0, %v135_v12  ;;  %526 = vmatpush.bf16.msrb.mxu2 %v797_v56 }
  0x36   :  { %482 = vmatpush.bf16.msrb.mxu0 %v794_v48 }
  0x37   :  { %389 = vmatpush.bf16.msrb.mxu1 %v599_v40 }
  0x38   :  { %527 = vmatpush.bf16.msrb.mxu2 %v796_v58 }
  0x3a   :  { %483 = vmatpush.bf16.msrb.mxu0 %v793_v49 }
  0x3b   :  { %390 = vmatpush.bf16.msrb.mxu1 %v587_v43 }
  0x3e   :  { %484 = vmatpush.bf16.msrb.mxu0 %v792_v50 }
  0x3f   :  { %391 = vmatpush.bf16.msrb.mxu1 %v575_v46 }
  0x42   :  { %392 = vmatmul.bf16.vlgmr.msrb.gmra.mxu1 %v134_v39  ;;  %485 = vmatpush.bf16.msrb.mxu0 %v791_v51 }
  0x46   :  { %486 = vmatpush.bf16.msrb.mxu0 %v790_v52 }
  0x4a   :  { %487 = vmatpush.bf16.msrb.mxu0 %v789_v53 }
  0x4e   :  { %488 = vmatpush.bf16.msrb.mxu0 %v788_v54 }
  0xa2   :  { %v354_v55 = vpop.f32.mrf.mxu1 }
  0xa7   :  { %v380_v57 = vpop.f32.mrf.mxu3 }
  0xaa   :  { %v356_v59 = vpop.f32.mrf.mxu1 }
  0xae   :  { %v341_v60 = vpop.f32.mrf.mxu0 }
  0xaf   :  { %v382_v61 = vpop.f32.mrf.mxu3  ;;  %v342_v5 = vadd.f32 %v341_v60, %v126_v0 }
  0xb1   :  { %v355_v9 = vadd.f32 %v354_v55, %v342_v5 }
  0xb6   :  { %v367_v1 = vpop.f32.mrf.mxu2  ;;  %v343_v2 = vpop.f32.mrf.mxu0 }
  0xb7   :  { %v368_v3 = vadd.f32 %v367_v1, %v127_v63  ;;  %v406_v4 = vpop.f32.mrf.mxu3 }
  0xb9   :  { %v381_v7 = vadd.f32 %v380_v57, %v368_v3 }
  0xbb   :  { %v410_v12 = vmax.f32 %v355_v9, %v381_v7 }
  0xbe   :  { %v369_v11 = vpop.f32.mrf.mxu2 }
  0xbf   :  { %v393_v8 = vpop.f32.mrf.mxu1  ;;  %v408_v14 = vpop.f32.mrf.mxu3 }
  0xc0   :  { %v394_v10 = vadd.f32 %v393_v8, %v128_v6 }
  0xc2   :  { %v407_v13 = vadd.f32 %v406_v4, %v394_v10 }
  0xc4   :  { %v411_v15 = vmax.f32 %v410_v12, %v407_v13 }
  0xc6   :  { %v412_v16 = vpack.c.bf16 %v411_v15, %v411_v15 }
  0xc7   :  { %v395_v17 = vpop.f32.mrf.mxu1 }
  0xc8   :  { %489 = vmatmul.bf16.vlgmr.msrb.gmra.mxu0 %v412_v16 }
 0x145   :  { %v490_v19 = vpop.f32.mrf.mxu0 }
 0x146   :  { %v491_v20 = vadd.f32 %v806_v18, %v490_v19 }
 0x148   :  { %v494_v21 = vmax.f32 %v491_v20, 0.0 }
 0x14a   :  { %v495_v22 = vpack.c.bf16 %v494_v21, %v494_v21 }
 0x14c   :  { %751 = vmatmul.msk.bf16.vlgmr.msrb.gmra.mxu2 %vm516_vm1, %v495_v22 }
 0x14d   :  { %v492_v23 = vpop.f32.mrf.mxu0 }
 0x1cf   :  { %v529_v25 = vpop.f32.mrf.mxu2 }
 0x1d0   :  { %v530_v26 = vadd.f32 %v807_v24, %v529_v25 }
 0x1d2   :  { %808 = vtanh.f32 %v530_v26 }
 0x1d7   :  { %v531_v27 = vpop.f32.mrf.mxu2 }
 0x1d8   :  { %v809_v28 = vpop.eup %808 }
 0x1d9   :  { %v534_v29 = vand.u32 2147483647, %v809_v28 }
 0x1db   :  { %v536_v30 = vsel %vm535_vm2, %v534_v29, 0.0 }
 0x1dc   :  { %537 = vadd.xlane.f32.xlu0 %v536_v30 }
 0x24f   :  { %v538_v31 = vpop.xlane.xlu0 %537 }
 0x250   :  { %v539_v32 = vmax.f32 %v538_v31, 1e-12 }
 0x252   :  { %810 = vrcp.f32 %v539_v32 }
 0x258   :  { %v811_v33 = vpop.eup %810 }
 0x259   :  { %v541_v34 = vmul.f32 %v811_v33, %v539_v32 }
 0x25b   :  { %v542_v35 = vsub.f32 2.0, %v541_v34 }
 0x25d   :  { %v543_v36 = vmul.f32 %v811_v33, %v542_v35 }
 0x25f   :  { %v544_v37 = vmul.f32 %v809_v28, %v543_v36 }
 0x261   :  { %545 = vst.msk [vmem:[#allocation8] sm:$0x3] %vm535_vm2, %v544_v37 }
 0x262   :  { %556 = dma.vmem_to_hbm [thread:$0]  %s552_s23, 32, %s554_s25, [#allocation4]  }
 0x263   :  { %912 = dma.done.wait [#allocation4], 32  }
 0x264   :  { %913 = vsyncadd [#allocation4], 4294967264 }
 0x265   :  { %561 = vsyncpa [#allocation3], 1 }
 0x266   :  { %562 = vsyncpa [#allocation6], 1 }
 0x267   :  { %563 = vsyncpa [#allocation4], 1 }

</bundles_post_ra>
